<compile_context>
chip_gen: v6e
topology: v6e:2x2x1
jax: 0.10.0
libtpu: 0.0.40
codegen_flags: <defaults>
</compile_context>

<pallas_src>
import functools

import jax
import jax.numpy as jnp
from jax.experimental import pallas as pl
from jax.experimental.pallas import tpu as pltpu


# ---------------- tuning / generation-aware sizing ----------------
_X_BLOCK_TARGET = 1 << 20   # aim for >= ~1 MiB of x per block when folding batches


def _cdiv(a, b):
    return (a + b - 1) // b


def _round_down(x, m):
    return max(m, x // m * m)


@functools.lru_cache(maxsize=1)
def _tpu_config():
    """Returns (x_block_budget_bytes, vmem_limit_bytes) based on physical VMEM."""
    try:
        info = pltpu.get_tpu_info()
        vmem_phys = int(getattr(info, "vmem_capacity_bytes", 0)) or (64 << 20)
    except Exception:
        vmem_phys = 64 << 20                      # conservative (v7x-like) default
    if vmem_phys >= (100 << 20):                  # v5e / v6e: 128 MiB physical VMEM
        return 8 << 20, 100 << 20
    return 4 << 20, 48 << 20                      # v7x: 64 MiB physical VMEM


# ---------------- fused single-pass kernel ----------------
def _make_fused_kernel(inv_hw, use_mxu):
    def kernel(x_ref, w1t_ref, b1_ref, w2t_ref, b2_ref, ws_ref, o_ref):
        x = x_ref[...]                                    # (Bt, C, HW), native dtype
        bt, c, _ = x.shape
        cd = x.dtype

        # ---- channel SE: AdaptiveAvgPool2d(1) -> fc1 -> ReLU -> fc2 -> sigmoid ----
        pooled = jnp.sum(x, axis=-1, dtype=jnp.float32) * inv_hw            # (Bt, C)
        y1 = jnp.dot(pooled, w1t_ref[...],
                     preferred_element_type=jnp.float32) + b1_ref[...]      # (Bt, Cr)
        y1 = jnp.maximum(y1, 0.0)
        y2 = jnp.dot(y1, w2t_ref[...],
                     preferred_element_type=jnp.float32) + b2_ref[...]      # (Bt, C)
        chn = jax.nn.sigmoid(y2)                                            # (Bt, C) f32

        # ---- spatial SE: 1x1 conv C -> 1 (no bias) + sigmoid ----
        if use_mxu:
            # Batched MXU matvec over C keeps the heavy reduction off the VPU.
            ws_b = jnp.broadcast_to(ws_ref[...].astype(cd), (bt, 1, c))     # (Bt,1,C)
            s_log = jnp.einsum('boc,bcs->bos', ws_b, x,
                               preferred_element_type=jnp.float32)          # (Bt,1,HW)
        else:
            # Exact f32 VPU multiply + channel reduce (f32 I/O stays HBM-bound).
            s_log = jnp.sum(x.astype(jnp.float32) * ws_ref[...],
                            axis=1, keepdims=True)                          # (Bt,1,HW)
        s = jax.nn.sigmoid(s_log)                                           # (Bt,1,HW) f32

        # chn_se*x + x*spa_se == x * (chn + s); gate applied in the input dtype.
        gate = chn.astype(cd)[:, :, None] + s.astype(cd)                    # (Bt,C,HW)
        o_ref[...] = (x * gate).astype(o_ref.dtype)
    return kernel


# ---------------- two-pass path: pointwise kernel ----------------
def _make_pointwise_kernel(use_mxu):
    def kernel(x_ref, chn_ref, ws_ref, o_ref):
        x = x_ref[...]                                    # (C, HWt), native dtype
        cd = x.dtype
        if use_mxu:
            s_log = jnp.dot(ws_ref[...].astype(cd), x,
                            preferred_element_type=jnp.float32)             # (1, HWt)
        else:
            s_log = jnp.sum(x.astype(jnp.float32) * ws_ref[...],
                            axis=0, keepdims=True)                          # ws: (C,1)
        s = jax.nn.sigmoid(s_log)
        gate = chn_ref[...].astype(cd) + s.astype(cd)     # (C,1)+(1,HWt) -> (C,HWt)
        o_ref[...] = (x * gate).astype(o_ref.dtype)
    return kernel


def _channel_gate(x_nchw, w1, b1, w2, b2):
    # Tiny (N*C-sized) computation; one fused XLA reduce over un-padded x.
    pooled = jnp.mean(x_nchw, axis=(2, 3), dtype=jnp.float32)   # (N, C)
    y1 = jnp.maximum(pooled @ w1.T + b1[None, :], 0.0)          # (N, Cr)
    y2 = y1 @ w2.T + b2[None, :]                                # (N, C)
    return jax.nn.sigmoid(y2)                                   # (N, C) f32


# ---------------- wrapper ----------------
def scse_forward(x_nchw, w1, b1, w2, b2, ws, *, force_two_pass=False):
    N, C, H, W = x_nchw.shape
    HW = H * W
    Cr = w1.shape[0]
    dt = x_nchw.dtype
    esize = jnp.dtype(dt).itemsize
    f32 = jnp.float32

    budget, vmem_limit = _tpu_config()

    w1f, b1f = w1.astype(f32), b1.astype(f32)
    w2f, b2f = w2.astype(f32), b2.astype(f32)
    wsf = ws.reshape(1, C).astype(f32)
    use_mxu = dt != jnp.float32          # MXU reduction + narrow-dtype gating for bf16/fp16

    x_flat = x_nchw.reshape(N, C, HW)    # layout no-op; no extra HBM passes
    bytes_per_batch = C * HW * esize
    use_fused = (not force_two_pass) and bytes_per_batch <= budget

    if use_fused:
        # Fold batches up to the budget; keep >=2 grid steps (v7x megacore) when N>=2,
        # and >=4 when blocks stay comfortably large.
        Bt = max(1, min(N, budget // bytes_per_batch))
        if N >= 2:
            Bt = min(Bt, _cdiv(N, 2))
        if N >= 4 and _cdiv(N, 4) * bytes_per_batch >= _X_BLOCK_TARGET:
            Bt = min(Bt, _cdiv(N, 4))
        grid_n = _cdiv(N, Bt)            # ragged last batch block handled by write masking

        ws_arg = wsf.reshape(1, 1, C) if use_mxu else wsf.reshape(1, C, 1)
        ws_spec = (pl.BlockSpec((1, 1, C), lambda n: (0, 0, 0)) if use_mxu
                   else pl.BlockSpec((1, C, 1), lambda n: (0, 0, 0)))

        out = pl.pallas_call(
            _make_fused_kernel(1.0 / HW, use_mxu),
            out_shape=jax.ShapeDtypeStruct((N, C, HW), dt),
            grid_spec=pltpu.PrefetchScalarGridSpec(
                num_scalar_prefetch=0,
                grid=(grid_n,),
                in_specs=[
                    pl.BlockSpec((Bt, C, HW), lambda n: (n, 0, 0)),   # x (batch folded)
                    pl.BlockSpec((C, Cr), lambda n: (0, 0)),          # fc1 weight (pre-T)
                    pl.BlockSpec((1, Cr), lambda n: (0, 0)),          # fc1 bias
                    pl.BlockSpec((Cr, C), lambda n: (0, 0)),          # fc2 weight (pre-T)
                    pl.BlockSpec((1, C), lambda n: (0, 0)),           # fc2 bias
                    ws_spec,                                          # spatial_se weight
                ],
                out_specs=pl.BlockSpec((Bt, C, HW), lambda n: (n, 0, 0)),
            ),
            compiler_params=pltpu.CompilerParams(
                dimension_semantics=("parallel",),
                vmem_limit_bytes=vmem_limit),
        )(x_flat,
          w1f.T, b1f.reshape(1, Cr),
          w2f.T, b2f.reshape(1, C),
          ws_arg)
        return out.reshape(N, C, H, W)

    # ---------- two-pass fallback: one (C, HW) slab exceeds the block budget ----------
    # Pass 1 (tiny): channel gate from un-padded x — exactly one extra HBM read of x.
    chn = _channel_gate(x_nchw, w1f, b1f, w2f, b2f).reshape(N, C, 1)   # (N, C, 1) f32

    # Pass 2: HW-tiled pointwise kernel; ragged HW tail handled by write masking.
    max_hwt = _round_down(budget // (C * esize), 128)
    HWt = HW if HW <= max_hwt else max_hwt     # full-extent last dim exempt from 128 rule
    grid_hw = _cdiv(HW, HWt)

    ws_arg = wsf if use_mxu else wsf.reshape(C, 1)
    ws_spec = (pl.BlockSpec((1, C), lambda n, t: (0, 0)) if use_mxu
               else pl.BlockSpec((C, 1), lambda n, t: (0, 0)))

    out = pl.pallas_call(
        _make_pointwise_kernel(use_mxu),
        out_shape=jax.ShapeDtypeStruct((N, C, HW), dt),
        grid_spec=pltpu.PrefetchScalarGridSpec(
            num_scalar_prefetch=0,
            grid=(N, grid_hw),
            in_specs=[
                pl.BlockSpec((None, C, HWt), lambda n, t: (n, 0, t)),  # x tile (batch squeezed)
                pl.BlockSpec((None, C, 1), lambda n, t: (n, 0, 0)),    # channel gate
                ws_spec,                                               # spatial_se weight
            ],
            out_specs=pl.BlockSpec((None, C, HWt), lambda n, t: (n, 0, t)),
        ),
        compiler_params=pltpu.CompilerParams(
            dimension_semantics=("parallel", "parallel"),
            vmem_limit_bytes=vmem_limit),
    )(x_flat, chn, ws_arg)
    return out.reshape(N, C, H, W)


# ---------------- pure-JAX reference (matches PyTorch forward, concat=False) ----------------
def scse_reference(x, w1, b1, w2, b2, ws):
    x = x.astype(jnp.float32)
    pooled = jnp.mean(x, axis=(2, 3), keepdims=True)                    # (N,C,1,1)
    y1 = jnp.einsum('rc,ncij->nrij', w1, pooled) + b1[None, :, None, None]
    y1 = jnp.maximum(y1, 0.0)
    y2 = jnp.einsum('cr,nrij->ncij', w2, y1) + b2[None, :, None, None]
    chn_se = jax.nn.sigmoid(y2) * x
    spa = jax.nn.sigmoid(jnp.einsum('oc,nchw->nohw', ws, x))            # (N,1,H,W)
    return chn_se + x * spa


if __name__ == "__main__":
    N, C, H, W = 2, 32, 16, 16
    reduction = 16
    Cr = C // reduction

    key = jax.random.PRNGKey(0)
    kx, k1, kb1, k2, kb2, ks = jax.random.split(key, 6)

    x = jax.random.normal(kx, (N, C, H, W), dtype=jnp.float32)
    w1 = 0.1 * jax.random.normal(k1, (Cr, C), dtype=jnp.float32)   # fc1: (C//r, C, 1, 1)
    b1 = 0.05 * jax.random.normal(kb1, (Cr,), dtype=jnp.float32)
    w2 = 0.1 * jax.random.normal(k2, (C, Cr), dtype=jnp.float32)   # fc2: (C, C//r, 1, 1)
    b2 = 0.05 * jax.random.normal(kb2, (C,), dtype=jnp.float32)
    ws = 0.1 * jax.random.normal(ks, (1, C), dtype=jnp.float32)    # spatial_se: (1, C, 1, 1)

    ref = scse_reference(x, w1, b1, w2, b2, ws)

    # 1) fused single-pass (>=2 grid steps, lane-dense full-HW blocks, no pad/slice)
    out = jax.block_until_ready(scse_forward(x, w1, b1, w2, b2, ws))
    assert out.shape == (N, C, H, W) and out.dtype == x.dtype
    assert jnp.allclose(out, ref, atol=1e-5, rtol=1e-5), "fused path mismatch"

    # 2) two-pass fallback (channel gate + HW-tiled pointwise kernel)
    out2 = jax.block_until_ready(scse_forward(x, w1, b1, w2, b2, ws, force_two_pass=True))
    assert jnp.allclose(out2, ref, atol=1e-5, rtol=1e-5), "two-pass path mismatch"

    # 3) non-128-multiple spatial extent (H*W = 100): full-extent last dim, masked stores
    x_odd = jax.random.normal(kx, (N, C, 10, 10), dtype=jnp.float32)
    ref_odd = scse_reference(x_odd, w1, b1, w2, b2, ws)
    out3 = jax.block_until_ready(scse_forward(x_odd, w1, b1, w2, b2, ws))
    assert out3.shape == (N, C, 10, 10)
    assert jnp.allclose(out3, ref_odd, atol=1e-5, rtol=1e-5), "unpadded-HW path mismatch"

    # 4) bf16 activations: narrow HBM I/O, MXU spatial reduction, bf16 gating multiply
    x_bf = x.astype(jnp.bfloat16)
    ref_bf = scse_reference(x_bf.astype(jnp.float32), w1, b1, w2, b2, ws)
    out4 = jax.block_until_ready(scse_forward(x_bf, w1, b1, w2, b2, ws))
    assert out4.dtype == jnp.bfloat16
    assert jnp.allclose(out4.astype(jnp.float32), ref_bf, atol=5e-2, rtol=5e-2), "bf16 mismatch"

    print("KERNEL_OK")
</pallas_src>

<mosaic_0001>
module attributes {stable_mosaic.version = 11 : i64} {
  func.func @kernel(%arg0: i32, %arg1: memref<1x32x256xf32, #tpu.memory_space<vmem>>, %arg2: memref<32x2xf32, #tpu.memory_space<vmem>>, %arg3: memref<1x2xf32, #tpu.memory_space<vmem>>, %arg4: memref<2x32xf32, #tpu.memory_space<vmem>>, %arg5: memref<1x32xf32, #tpu.memory_space<vmem>>, %arg6: memref<1x32x1xf32, #tpu.memory_space<vmem>>, %arg7: memref<1x32x256xf32, #tpu.memory_space<vmem>>) attributes {dimension_semantics = [#tpu.dimension_semantics<parallel>], iteration_bounds = array<i64: 2>, scalar_prefetch = 0 : i64, scratch_operands = 0 : i64, tpu.core_type = #tpu.core_type<tc>, window_params = [{transform_indices = @transform_0, window_bounds = array<i64: 1, 32, 256>}, {pipeline_mode = #tpu.pipeline_mode<synchronous>, transform_indices = @transform_1, window_bounds = array<i64: 32, 2>}, {pipeline_mode = #tpu.pipeline_mode<synchronous>, transform_indices = @transform_2, window_bounds = array<i64: 1, 2>}, {pipeline_mode = #tpu.pipeline_mode<synchronous>, transform_indices = @transform_3, window_bounds = array<i64: 2, 32>}, {pipeline_mode = #tpu.pipeline_mode<synchronous>, transform_indices = @transform_4, window_bounds = array<i64: 1, 32>}, {pipeline_mode = #tpu.pipeline_mode<synchronous>, transform_indices = @transform_5, window_bounds = array<i64: 1, 32, 1>}, {transform_indices = @transform_6, window_bounds = array<i64: 1, 32, 256>}]} {
    %c0 = arith.constant 0 : index
    %c0_0 = arith.constant 0 : index
    %c0_1 = arith.constant 0 : index
    %0 = vector.load %arg1[%c0, %c0_0, %c0_1] : memref<1x32x256xf32, #tpu.memory_space<vmem>>, vector<1x32x256xf32>
    %cst = arith.constant dense<0.000000e+00> : vector<1x32xf32>
    %1 = vector.multi_reduction <add>, %0, %cst [2] : vector<1x32x256xf32> to vector<1x32xf32>
    %cst_2 = arith.constant 3.906250e-03 : f32
    %2 = vector.broadcast %cst_2 : f32 to vector<1x32xf32>
    %3 = arith.mulf %1, %2 : vector<1x32xf32>
    %c0_3 = arith.constant 0 : index
    %c0_4 = arith.constant 0 : index
    %4 = vector.load %arg2[%c0_3, %c0_4] : memref<32x2xf32, #tpu.memory_space<vmem>>, vector<32x2xf32>
    %cst_5 = arith.constant dense<0.000000e+00> : vector<1x2xf32>
    %5 = tpu.matmul %3, %4, %cst_5 {dimension_numbers = #tpu.dot_dimension_numbers<[1], [0], [0], [1], [0, 0, 1, 1], [], []>} : vector<1x32xf32>, vector<32x2xf32>, vector<1x2xf32> -> vector<1x2xf32>
    %c0_6 = arith.constant 0 : index
    %c0_7 = arith.constant 0 : index
    %6 = vector.load %arg3[%c0_6, %c0_7] : memref<1x2xf32, #tpu.memory_space<vmem>>, vector<1x2xf32>
    %7 = arith.addf %5, %6 : vector<1x2xf32>
    %cst_8 = arith.constant 0.000000e+00 : f32
    %8 = vector.broadcast %cst_8 : f32 to vector<1x2xf32>
    %9 = arith.maximumf %7, %8 : vector<1x2xf32>
    %c0_9 = arith.constant 0 : index
    %c0_10 = arith.constant 0 : index
    %10 = vector.load %arg4[%c0_9, %c0_10] : memref<2x32xf32, #tpu.memory_space<vmem>>, vector<2x32xf32>
    %cst_11 = arith.constant dense<0.000000e+00> : vector<1x32xf32>
    %11 = tpu.matmul %9, %10, %cst_11 {dimension_numbers = #tpu.dot_dimension_numbers<[1], [0], [0], [1], [0, 0, 1, 1], [], []>} : vector<1x2xf32>, vector<2x32xf32>, vector<1x32xf32> -> vector<1x32xf32>
    %c0_12 = arith.constant 0 : index
    %c0_13 = arith.constant 0 : index
    %12 = vector.load %arg5[%c0_12, %c0_13] : memref<1x32xf32, #tpu.memory_space<vmem>>, vector<1x32xf32>
    %13 = arith.addf %11, %12 : vector<1x32xf32>
    %14 = arith.negf %13 : vector<1x32xf32>
    %15 = math.exp %14 : vector<1x32xf32>
    %cst_14 = arith.constant 1.000000e+00 : f32
    %16 = vector.broadcast %cst_14 : f32 to vector<1x32xf32>
    %17 = arith.addf %16, %15 : vector<1x32xf32>
    %18 = arith.divf %16, %17 : vector<1x32xf32>
    %c0_15 = arith.constant 0 : index
    %c0_16 = arith.constant 0 : index
    %c0_17 = arith.constant 0 : index
    %19 = vector.load %arg6[%c0_15, %c0_16, %c0_17] : memref<1x32x1xf32, #tpu.memory_space<vmem>>, vector<1x32x1xf32>
    %20 = vector.broadcast %19 : vector<1x32x1xf32> to vector<1x32x256xf32>
    %21 = arith.mulf %0, %20 : vector<1x32x256xf32>
    %cst_18 = arith.constant dense<0.000000e+00> : vector<1x256xf32>
    %22 = vector.multi_reduction <add>, %21, %cst_18 [1] : vector<1x32x256xf32> to vector<1x256xf32>
    %23 = vector.shape_cast %22 : vector<1x256xf32> to vector<1x1x256xf32>
    %24 = arith.negf %23 : vector<1x1x256xf32>
    %25 = math.exp %24 : vector<1x1x256xf32>
    %cst_19 = arith.constant 1.000000e+00 : f32
    %26 = vector.broadcast %cst_19 : f32 to vector<1x1x256xf32>
    %27 = arith.addf %26, %25 : vector<1x1x256xf32>
    %28 = arith.divf %26, %27 : vector<1x1x256xf32>
    %29 = vector.shape_cast %18 : vector<1x32xf32> to vector<1x32x1xf32>
    %30 = vector.broadcast %29 : vector<1x32x1xf32> to vector<1x32x256xf32>
    %31 = vector.broadcast %28 : vector<1x1x256xf32> to vector<1x32x256xf32>
    %32 = arith.addf %30, %31 : vector<1x32x256xf32>
    %33 = arith.mulf %0, %32 : vector<1x32x256xf32>
    %c0_20 = arith.constant 0 : index
    %c0_21 = arith.constant 0 : index
    %c0_22 = arith.constant 0 : index
    %34 = vector.load %arg7[%c0_20, %c0_21, %c0_22] : memref<1x32x256xf32, #tpu.memory_space<vmem>>, vector<1x32x256xf32>
    tpu.vector_store %arg7[%c0_20, %c0_21, %c0_22], %33 {strides = array<i32>} : memref<1x32x256xf32, #tpu.memory_space<vmem>>, vector<1x32x256xf32>,
    return
  }
  func.func @transform_0(%arg0: i32) -> (i32, i32, i32) {
    %c0_i32 = arith.constant 0 : i32
    %c0_i32_0 = arith.constant 0 : i32
    %c0_i32_1 = arith.constant 0 : i32
    return %arg0, %c0_i32, %c0_i32_0 : i32, i32, i32
  }
  func.func @transform_1(%arg0: i32) -> (i32, i32) {
    %c0_i32 = arith.constant 0 : i32
    %c0_i32_0 = arith.constant 0 : i32
    %c0_i32_1 = arith.constant 0 : i32
    return %c0_i32, %c0_i32_0 : i32, i32
  }
  func.func @transform_2(%arg0: i32) -> (i32, i32) {
    %c0_i32 = arith.constant 0 : i32
    %c0_i32_0 = arith.constant 0 : i32
    %c0_i32_1 = arith.constant 0 : i32
    return %c0_i32, %c0_i32_0 : i32, i32
  }
  func.func @transform_3(%arg0: i32) -> (i32, i32) {
    %c0_i32 = arith.constant 0 : i32
    %c0_i32_0 = arith.constant 0 : i32
    %c0_i32_1 = arith.constant 0 : i32
    return %c0_i32, %c0_i32_0 : i32, i32
  }
  func.func @transform_4(%arg0: i32) -> (i32, i32) {
    %c0_i32 = arith.constant 0 : i32
    %c0_i32_0 = arith.constant 0 : i32
    %c0_i32_1 = arith.constant 0 : i32
    return %c0_i32, %c0_i32_0 : i32, i32
  }
  func.func @transform_5(%arg0: i32) -> (i32, i32, i32) {
    %c0_i32 = arith.constant 0 : i32
    %c0_i32_0 = arith.constant 0 : i32
    %c0_i32_1 = arith.constant 0 : i32
    %c0_i32_2 = arith.constant 0 : i32
    return %c0_i32, %c0_i32_0, %c0_i32_1 : i32, i32, i32
  }
  func.func @transform_6(%arg0: i32) -> (i32, i32, i32) {
    %c0_i32 = arith.constant 0 : i32
    %c0_i32_0 = arith.constant 0 : i32
    %c0_i32_1 = arith.constant 0 : i32
    return %arg0, %c0_i32, %c0_i32_0 : i32, i32, i32
  }
}

</mosaic_0001>

<bundles_post_ra>
// kernel: tpu_custom_call.1
= control target key start
LH: loop header
LB: loop body
LE: loop exit
PB: predicated region body
PF: predicated region fallthrough
CT: control target
= control target key end

     0   :  { %11 = vsyncpa [#allocation3], 0  ;;  %s1163_s0 = inlined_call_operand.hbm [shape: f32[2,32,256], index: 0, kind: input, shape index: {}]   ;;  %s1164_s1 = inlined_call_operand.vmem [shape: f32[32,2], index: 1, kind: input, shape index: {}]   ;;  %s1165_s2 = inlined_call_operand.vmem [shape: f32[1,2], index: 2, kind: input, shape index: {}]   ;;  %s1166_s3 = inlined_call_operand.vmem [shape: f32[2,32], index: 3, kind: input, shape index: {}]   ;;  %s1167_s4 = inlined_call_operand.vmem [shape: f32[1,32], index: 4, kind: input, shape index: {}]   ;;  %s1168_s5 = inlined_call_operand.vmem [shape: f32[1,32,1], index: 5, kind: input, shape index: {}]   ;;  %s1169_s6 = inlined_call_operand.hbm [shape: f32[2,32,256], index: 6, kind: output, shape index: {}]  }
   0x1   :  { %13 = vsyncpa [#allocation3 + $0x1], 0 }
   0x2   :  { %14 = vsyncpa [#allocation4], 0 }
   0x3   :  { %16 = vsyncpa [#allocation4 + $0x1], 0  ;;  %s932_s21 = smov 0   ;;  %s934_s22 = smov 0  }
   0x4   :  { %s936_s23 = smov 0   ;;  %s938_s24 = smov 0  }
   0x5 LB: > { %s953_s25 = sadd.s32 4294967295, %s886_s24   ;;  %s682_s26 = sadd.s32 4294967294, %s886_s24   ;;  %s886_s24 = sphi %s938_s24, %s1184_s24   ;;  %s882_s23 = sphi %s936_s23, %s1183_s23   ;;  %s878_s22 = sphi %s934_s22, %s1182_s22   ;;  %s874_s21 = sphi %s932_s21, %s1181_s21  }
   0x6   : > { %s957_s27 = sadd.s32 1, %s886_s24   ;;  %s29_s28 = sadd.s32 1, %s882_s23 }
   0x7   : > { %s26_s29 = ssub.s32 %s886_s24, %s957_s27  ;;  %p36_p0 = scmp.ne.s32.totalorder %s882_s23, %s878_s22 }
   0x8   : > { %p27_p1 = scmp.eq.s32.totalorder %s26_s29, 0  ;;  %p37_p2 = scmp.eq.s32.totalorder %s886_s24, 0 }
   0x9   : > { %p42_p3 = scmp.ne.s32.totalorder %s878_s22, %s874_s21  ;;  %p43_p4 = scmp.eq.s32.totalorder %s953_s25, 0 }
   0xa   : > { %s969_s30 = scalar_select %p27_p1, %s882_s23, %s29_s28  }
   0xb   : > { %p971_p5 = por %p37_p2, %p36_p0  ;;  %p975_p6 = por %p43_p4, %p42_p3 }
   0xc   : > { %p171_p7 = scmp.eq.s32.totalorder %s953_s25, 1  ;;  %p177_p8 = scmp.eq.s32.totalorder %s682_s26, 1 }
   0xd   : > { %s1173_s8 = scalar_select %p975_p6, 1, 0 }
   0xe   : > { %p739_p10 = scmp.lt.s32.totalorder %s886_s24, 2  ;;  %p982_p11 = por %p171_p7, %p36_p0 }
   0xf   : > { %p986_p12 = por %p177_p8, %p42_p3  ;;  %s212_s11 = sand.u32 1, %s882_s23  }
  0x10   : > { %s1174_s9 = scalar_select %p982_p11, 1, 0 }
  0x11   : > { %s1175_s10 = scalar_select %p986_p12, 1, 0 }
  0x12   : > { %s702_s12 = sshll.u32 %s886_s24, 10  ;;  %s685_s13 = sshll.u32 %s212_s11, 6 }
  0x13   : > { %s995_s16 = scalar_lea.hbm %s1163_s0, %s702_s12  ;;  %s216_s17 = scalar_lea.vmem [#allocation2], %s685_s13 }
  0x14   : > { %s223_s18 = sshll.u32 %s216_s17, 4  ;;  %p999_p13 = pnand %p739_p10, %p971_p5  ;;  %s1003_s18 = int_to_ptr.vmem [resolvable:$true] %s223_s18 }
  0x15   : > { %s1005_s20 = scalar_lea.sflag [#allocation3], %s212_s11  ;;  %s794_s26 = scalar_lea.hbm %s995_s16, 1024 }
  0x16   : > { %p795_p0 = scmp.ne.s32.totalorder %s995_s16, %s794_s26  ;;  %p796_p1 = pneg %p999_p13 }
  0x17   : > { %s799_s12 = scalar_lea.hbm %s1163_s0, 2048  ;;  %p800_p4 = scmp.lt.s32.totalorder %s995_s16, %s1163_s0 }
  0x18   : > { %p797_p2 = pnand %p796_p1, %p795_p0  ;;  %p801_p5 = scmp.lt.s32.totalorder %s799_s12, %s794_s26 }
  0x1a   : > { %p798_p3 = pneg %p797_p2  ;;  %p802_p7 = por %p801_p5, %p800_p4 }
  0x1c   : > { %p803_p8 = pnand %p802_p7, %p798_p3 }
  0x1e   : > { %806 = shalt.err (!%p803_p8)
}
  0x1f   : > { %s807_s11 = scalar_lea.vmem %s1003_s18, 1024  ;;  %s888_s14 = smov [#allocation2]  }
  0x20   : > { %p808_p10 = scmp.ne.s32.totalorder %s1003_s18, %s807_s11  ;;  %s812_s15 = sshll.u32 %s888_s14, 4  ;;  %s813_s15 = int_to_ptr.vmem [resolvable:$false] %s812_s15 }
  0x21   : > { %s814_s17 = scalar_lea.vmem %s813_s15, 2048  ;;  %p815_p2 = scmp.lt.s32.totalorder %s1003_s18, %s813_s15 }
  0x22   : > { %p810_p9 = pnand %p808_p10, %p796_p1  ;;  %p816_p12 = scmp.lt.s32.totalorder %s814_s17, %s807_s11 }
  0x24   : > { %p811_p0 = pneg %p810_p9  ;;  %p817_p11 = por %p816_p12, %p815_p2 }
  0x26   : > { %p818_p6 = pnand %p817_p11, %p811_p0 }
  0x28   : > { %821 = shalt.err (!%p818_p6)
}
  0x29   : > { %s889_s26 = smov 256   ;;  %s890_s28 = smov 16  }
  0x2a   : > { %734 = dma.hbm_to_vmem [thread:$0]  (!%p999_p13), %s995_s16, 1024, %s1003_s18, %s1005_s20, %s889_s26, %s889_s26, %s890_s28  }
  0x2b   : > { %p688_p9 = scmp.ge.s32.totalorder %s886_s24, 1  ;;  %p231_p1 = scmp.lt.s32.totalorder %s886_s24, 3 }
  0x2d   : > { %p232_p3 = pnand %p688_p9, %p231_p1 }
  0x2e   : > { %s1029_s29 = sand.u32 (!%p232_p3), 1, %s878_s22   ;;  %p1177_p6 = scmp.ne.s32.totalorder (!%p232_p3), %s1173_s8, 0 }
  0x2f   : > { %235 = sbr.rel (%p232_p3) target bundleno = 776 (0x308), region = 44  ;;  %s689_s12 = sshll.u32 (!%p232_p3), %s1029_s29, 6 }
  0x30   : > { %s238_s7 = scalar_lea.sflag (!%p232_p3), [#allocation3], %s1029_s29  ;;  %s241_s13 = scalar_lea.vmem (!%p232_p3), [#allocation2], %s689_s12 }
  0x34   : > { %865 = dma.done.wait (%p1177_p6), %s238_s7, 1024  }
  0x35   : > { %867 = vsyncadd (%p1177_p6), %s238_s7, 4294966272  ;;  %v1039_v0 = vld [vmem:[%s241_s13] sm:$0xff]  ;;  %v1041_v1 = vld [vmem:[%s241_s13 + $0x8] sm:$0xff]  ;;  %v891_v12 = vmov 0.0   ;;  %vm892_vm0 = vmmov 0   ;;  %v303_v17 = vlaneseq  ;;  %vm314_vm1 = vcmask 130112  }
  0x36   : > { %v1043_v2 = vld [vmem:[%s241_s13 + $0x20] sm:$0xff]  ;;  %v278_v3 = vadd.f32 %v1041_v1, %v1039_v0  ;;  %v1047_v4 = vld [vmem:[%s241_s13 + $0x28] sm:$0xff]  ;;  %v1049_v5 = vld [vmem:[%s241_s13 + $0x10] sm:$0xff]  ;;  %711 = vmatprep.subr.mxu0 %v891_v12  ;;  %722 = vmatprep.subr.mxu1 %v891_v12  ;;  %vm321_vm2 = vcmask 195712   ;;  %vm328_vm3 = vcmask 261312   ;;  %vm330_vm4 = vcmask 261120  }
  0x37   : > { %v1051_v6 = vld [vmem:[%s241_s13 + $0x18] sm:$0xff]  ;;  %v284_v7 = vadd.f32 %v1047_v4, %v1043_v2  ;;  %v1055_v8 = vld [vmem:[%s241_s13 + $0x30] sm:$0xff]  ;;  %v295_v15 = vld [vmem:[%s1164_s1 + $0x8] sm:$0xff]  ;;  %719 = vmatprep.mubr.msk.f32.mxu0 %vm892_vm0, %v891_v12  ;;  %724 = vmatprep.mubr.msk.f32.mxu1 %vm892_vm0, %v891_v12  ;;  %v304_v18 = vand.u32 127, %v303_v17  ;;  %v306_v19 = vshrl.u32 %v303_v17, 7  ;;  %vm410_vm5 = vcmask 1041408  }
  0x38   : > { %v1057_v9 = vld [vmem:[%s241_s13 + $0x38] sm:$0xff]  ;;  %279 = vadd.xlane.f32.xlu0 %v278_v3  ;;  %v281_v10 = vadd.f32 %v1051_v6, %v1049_v5  ;;  %v296_v14 = vld [vmem:[%s1164_s1 + $0x10] sm:$0xff]  ;;  %v294_v16 = vld [vmem:[%s1164_s1] sm:$0xff]  ;;  %v893_v45 = vmov 0   ;;  %vm406_vm6 = vcmask 15360   ;;  %s269_s26 = scalar_lea.vmem [#allocation5], %s689_s12 }
  0x39   : > { %285 = vadd.xlane.f32.xlu1 %v284_v7  ;;  %v287_v11 = vadd.f32 %v1057_v9, %v1055_v8  ;;  %v297_v13 = vld [vmem:[%s1164_s1 + $0x18] sm:$0xff]  ;;  %v309_v20 = vadd.s32 4294967288, %v304_v18  ;;  %v316_v22 = vadd.s32 4294967280, %v304_v18  ;;  %v323_v23 = vadd.s32 4294967272, %v304_v18  ;;  %v404_v42 = vld [vmem:[%s1166_s3] sm:$0x3]  ;;  %780 = vset.pattern.permute.xlu0 %v893_v45 }
  0x3a   : > { %712 = vmatpush3.msra.mxu0 %v297_v13  ;;  %v307_v25 = vsub.s32 %v304_v18, %v306_v19  ;;  %723 = vmatpush3.msk.msra.mxu1 %vm410_vm5, %v404_v42  ;;  %v491_v43 = vld [vmem:[%s1168_s5 + $0x8] sm:$0xff]  ;;  %v490_v44 = vld [vmem:[%s1168_s5] sm:$0xff]  ;;  %v492_v46 = vld [vmem:[%s1168_s5 + $0x10] sm:$0xff]  ;;  %v554_v60 = vsub.s32 0, %v306_v19  ;;  %s703_s28 = sshll.u32 %s953_s25, 10  ;;  %s609_s12 = sshll.u32 %s269_s26, 4  ;;  %s1118_s12 = int_to_ptr.vmem [resolvable:$true] %s609_s12 }
  0x3b   : > { %713 = vmatprep.subr.mxu0 %v891_v12  ;;  %v312_v27 = vsub.s32 %v309_v20, %v306_v19  ;;  %v319_v28 = vsub.s32 %v316_v22, %v306_v19  ;;  %v326_v31 = vsub.s32 %v323_v23, %v306_v19  ;;  %781 = vset.pattern.permute.xlu1 %v893_v45  ;;  %v493_v47 = vld [vmem:[%s1168_s5 + $0x18] sm:$0xff]  ;;  %v298_v48 = vld [vmem:[%s1165_s2] sm:$0x1]  ;;  %s1116_s8 = scalar_lea.hbm %s1169_s6, %s703_s28  ;;  %s596_s25 = scalar_lea.sflag [#allocation4], %s1029_s29 }
  0x3c   : > { %282 = vadd.xlane.f32.xlu0 %v281_v10  ;;  %714 = vmatpush3.msra.mxu0 %v296_v14  ;;  %v405_v53 = vld [vmem:[%s1167_s4] sm:$0x1]  ;;  %s822_s16 = scalar_lea.vmem %s1118_s12, 1024  ;;  %p1178_p12 = scmp.ne.s32.totalorder %s1174_s9, 0 }
  0x3d   : > { %288 = vadd.xlane.f32.xlu1 %v287_v11  ;;  %715 = vmatprep.subr.mxu0 %v891_v12  ;;  %p823_p11 = scmp.ne.s32.totalorder %s1118_s12, %s822_s16  ;;  %s894_s18 = smov [#allocation5]  }
  0x3e   : > { %716 = vmatpush3.msra.mxu0 %v295_v15  ;;  %s826_s19 = sshll.u32 %s894_s18, 4  ;;  %s827_s19 = int_to_ptr.vmem [resolvable:$false] %s826_s19 }
  0x3f   : > { %717 = vmatprep.subr.mxu0 %v891_v12  ;;  %p824_p13 = pnand %p823_p11, %p1178_p12  ;;  %s828_s20 = scalar_lea.vmem %s827_s19, 2048 }
  0x40   : > { %718 = vmatpush3.msra.mxu0 %v294_v16  ;;  %p829_p5 = scmp.lt.s32.totalorder %s1118_s12, %s827_s19  ;;  %p830_p7 = scmp.lt.s32.totalorder %s828_s20, %s822_s16 }
  0x41   : > { %p825_p4 = pneg %p824_p13 }
  0x42   : > { %p831_p8 = por %p830_p7, %p829_p5 }
  0x44   : > { %p832_p10 = pnand %p831_p8, %p825_p4 }
  0x4e   : > { %501 = vperm.xlu1 %781, %v491_v43  }
  0x52   : > { %496 = vperm.xlu0 %780, %v490_v44   ;;  %506 = vperm.xlu1 %781, %v492_v46  }
  0x56   : > { %511 = vperm.xlu1 %781, %v493_v47  }
  0xc1   : > { %v280_v21 = vpop.xlane.xlu0 %279 }
  0xc2   : > { %v286_v24 = vpop.xlane.xlu1 %285  ;;  %v290_v26 = vmul.f32 0.00390625, %v280_v21 }
  0xc3   : > { %v292_v29 = vmul.f32 0.00390625, %v286_v24 }
  0xc4   : > { %v308_v35 = vrot.slane %v290_v26, %v307_v25 }
  0xc5   : > { %v283_v30 = vpop.xlane.xlu0 %282  ;;  %v320_v37 = vrot.slane %v292_v29, %v319_v28 }
  0xc6   : > { %v291_v32 = vmul.f32 0.00390625, %v283_v30  ;;  %v289_v33 = vpop.xlane.xlu1 %288 }
  0xc7   : > { %v293_v34 = vmul.f32 0.00390625, %v289_v33 }
  0xc8   : > { %v313_v36 = vrot.slane %v291_v32, %v312_v27 }
  0xc9   : > { %v327_v38 = vrot.slane %v293_v34, %v326_v31 }
  0xca   : > { %v315_v39 = vsel %vm314_vm1, %v313_v36, %v308_v35  ;;  %v502_v63 = vpop.permute.xlu1 %501 }
  0xcb   : > { %v322_v40 = vsel %vm321_vm2, %v320_v37, %v315_v39  ;;  %v516_v10 = vmul.f32 %v502_v63, %v1049_v5  ;;  %v517_v12 = vmul.f32 %v502_v63, %v1051_v6 }
  0xcc   : > { %v329_v41 = vsel %vm328_vm3, %v327_v38, %v322_v40 }
  0xcd   : > { %720 = vmatmul.mubr.msk.f32.vlgmr.msra.gmra.mxu0 %vm330_vm4, %v329_v41  ;;  %v497_v3 = vpop.permute.xlu0 %496 }
  0xce   : > { %v507_v7 = vpop.permute.xlu1 %506  ;;  %v514_v11 = vmul.f32 %v497_v3, %v1039_v0  ;;  %v515_v13 = vmul.f32 %v497_v3, %v1041_v1 }
  0xcf   : > { %v518_v14 = vmul.f32 %v507_v7, %v1043_v2  ;;  %v519_v16 = vmul.f32 %v507_v7, %v1047_v4 }
  0xd0   : > { %v522_v15 = vadd.f32 %v516_v10, %v514_v11  ;;  %v531_v17 = vadd.f32 %v517_v12, %v515_v13 }
  0xd2   : > { %v512_v18 = vpop.permute.xlu1 %511  ;;  %v523_v19 = vadd.f32 %v522_v15, %v518_v14  ;;  %v532_v21 = vadd.f32 %v531_v17, %v519_v16 }
  0xd3   : > { %v520_v20 = vmul.f32 %v512_v18, %v1055_v8  ;;  %v521_v22 = vmul.f32 %v512_v18, %v1057_v9 }
  0xd5   : > { %v524_v23 = vadd.f32 %v523_v19, %v520_v20  ;;  %v533_v24 = vadd.f32 %v532_v21, %v521_v22 }
  0xd7   : > { %v525_v25 = vrot.slane %v524_v23, 4  ;;  %v534_v26 = vrot.slane %v533_v24, 4 }
  0xd9   : > { %v526_v27 = vadd.f32 %v525_v25, %v524_v23  ;;  %v535_v28 = vadd.f32 %v534_v26, %v533_v24 }
  0xdb   : > { %v527_v29 = vrot.slane %v526_v27, 2  ;;  %v536_v30 = vrot.slane %v535_v28, 2 }
  0xdd   : > { %v528_v31 = vadd.f32 %v527_v29, %v526_v27  ;;  %v537_v32 = vadd.f32 %v536_v30, %v535_v28 }
  0xdf   : > { %v529_v33 = vrot.slane %v528_v31, 1  ;;  %v538_v34 = vrot.slane %v537_v32, 1 }
  0xe1   : > { %v530_v35 = vadd.f32 %v529_v33, %v528_v31  ;;  %v539_v36 = vadd.f32 %v538_v34, %v537_v32 }
  0xe3   : > { %v695_v37 = vmul.f32 -1.442695, %v530_v35  ;;  %v696_v38 = vmul.f32 -1.442695, %v539_v36 }
 0x18d   : > { %v399_v49 = vpop.f32.mrf.mxu0 }
 0x18e   : > { %v400_v50 = vadd.f32 %v399_v49, %v298_v48 }
 0x18f   : > { %v721_v51 = vpop.f32.mrf.mxu0 }
 0x190   : > { %v403_v52 = vmax.f32 %v400_v50, 0.0 }
 0x192   : > { %725 = vmatmul.mubr.msk.f32.vlgmr.msra.gmra.mxu1 %vm406_vm6, %v403_v52 }
 0x252   : > { %v480_v54 = vpop.f32.mrf.mxu1 }
 0x253   : > { %v481_v55 = vadd.f32 %v480_v54, %v405_v53 }
 0x254   : > { %v726_v56 = vpop.f32.mrf.mxu1 }
 0x255   : > { %v694_v57 = vmul.f32 -1.442695, %v481_v55 }
 0x257   : > { %782 = vpow2.f32 %v694_v57 }
 0x264   : > { %v783_v58 = vpop.eup %782 }
 0x265   : > { %v487_v59 = vadd.f32 1.0, %v783_v58 }
 0x267   : > { %784 = vrcp.f32 %v487_v59 }
 0x268   : > { %786 = vpow2.f32 %v695_v37 }
 0x269   : > { %788 = vpow2.f32 %v696_v38 }
 0x274   : > { %v785_v61 = vpop.eup %784 }
 0x275   : > { %v555_v62 = vrot.slane %v785_v61, %v554_v60  ;;  %v787_v39 = vpop.eup %786 }
 0x276   : > { %v789_v40 = vpop.eup %788  ;;  %v546_v41 = vadd.f32 1.0, %v787_v39 }
 0x277   : > { %557 = vbcast.lane.b32.xlu1 %v555_v62, 256  ;;  %v547_v42 = vadd.f32 1.0, %v789_v40 }
 0x278   : > { %790 = vrcp.f32 %v546_v41 }
 0x279   : > { %792 = vrcp.f32 %v547_v42 }
 0x27b   : > { %561 = vbcast.lane.b32.xlu1 %v555_v62, 264 }
 0x27f   : > { %565 = vbcast.lane.b32.xlu1 %v555_v62, 272 }
 0x283   : > { %569 = vbcast.lane.b32.xlu1 %v555_v62, 280 }
 0x285   : > { %v791_v43 = vpop.eup %790 }
 0x286   : > { %v793_v44 = vpop.eup %792 }
 0x2e9   : > { %v558_v45 = vpop.permute.xlu1 %557 }
 0x2ea   : > { %v571_v46 = vadd.f32 %v791_v43, %v558_v45  ;;  %v572_v47 = vadd.f32 %v793_v44, %v558_v45 }
 0x2ec   : > { %v579_v48 = vmul.f32 %v571_v46, %v1039_v0  ;;  %v580_v49 = vmul.f32 %v572_v47, %v1041_v1 }
 0x2ed   : > { %v562_v50 = vpop.permute.xlu1 %561 }
 0x2ee   : > { %587 = vst [vmem:[%s269_s26] sm:$0xff] %v579_v48  ;;  %588 = vst [vmem:[%s269_s26 + $0x8] sm:$0xff] %v580_v49  ;;  %v573_v51 = vadd.f32 %v791_v43, %v562_v50  ;;  %v574_v52 = vadd.f32 %v793_v44, %v562_v50 }
 0x2f0   : > { %v581_v53 = vmul.f32 %v573_v51, %v1049_v5  ;;  %v582_v54 = vmul.f32 %v574_v52, %v1051_v6 }
 0x2f1   : > { %v566_v55 = vpop.permute.xlu1 %565 }
 0x2f2   : > { %589 = vst [vmem:[%s269_s26 + $0x10] sm:$0xff] %v581_v53  ;;  %590 = vst [vmem:[%s269_s26 + $0x18] sm:$0xff] %v582_v54  ;;  %v575_v56 = vadd.f32 %v791_v43, %v566_v55  ;;  %v576_v57 = vadd.f32 %v793_v44, %v566_v55 }
 0x2f4   : > { %v583_v0 = vmul.f32 %v575_v56, %v1043_v2  ;;  %v584_v1 = vmul.f32 %v576_v57, %v1047_v4 }
 0x2f5   : > { %v570_v58 = vpop.permute.xlu1 %569 }
 0x2f6   : > { %591 = vst [vmem:[%s269_s26 + $0x20] sm:$0xff] %v583_v0  ;;  %592 = vst [vmem:[%s269_s26 + $0x28] sm:$0xff] %v584_v1  ;;  %v577_v59 = vadd.f32 %v791_v43, %v570_v58  ;;  %v578_v5 = vadd.f32 %v793_v44, %v570_v58 }
 0x2f8   : > { %v585_v2 = vmul.f32 %v577_v59, %v1055_v8  ;;  %v586_v4 = vmul.f32 %v578_v5, %v1057_v9 }
 0x2fa   : > { %593 = vst [vmem:[%s269_s26 + $0x30] sm:$0xff] %v585_v2  ;;  %594 = vst [vmem:[%s269_s26 + $0x38] sm:$0xff] %v586_v4 }
 0x2fb   : > { %835 = shalt.err (!%p832_p10)
}
 0x2fc   : > { %s836_s11 = scalar_lea.hbm %s1116_s8, 1024  ;;  %s840_s17 = scalar_lea.hbm %s1169_s6, 2048 }
 0x2fd   : > { %p837_p0 = scmp.ne.s32.totalorder %s1116_s8, %s836_s11  ;;  %p841_p1 = scmp.lt.s32.totalorder %s1116_s8, %s1169_s6 }
 0x2fe   : > { %p842_p3 = scmp.lt.s32.totalorder %s840_s17, %s836_s11 }
 0x2ff   : > { %p838_p2 = pnand %p837_p0, %p1178_p12 }
 0x300   : > { %p843_p6 = por %p842_p3, %p841_p1 }
 0x301   : > { %p839_p9 = pneg %p838_p2 }
 0x303   : > { %p844_p11 = pnand %p843_p6, %p839_p9 }
 0x305   : > { %847 = shalt.err (!%p844_p11)
}
 0x306   : > { %s895_s7 = smov 256   ;;  %s896_s13 = smov 16  }
 0x307   : > { %729 = dma.vmem_to_hbm [thread:$0]  (%p1178_p12), %s1118_s12, 1024, %s1116_s8, %s596_s25, %s895_s7, %s895_s7, %s896_s13  }
 0x308 PF: > { %s624_s16 = sand.u32 1, %s874_s21   ;;  %p1179_p13 = scmp.ne.s32.totalorder %s1175_s10, 0 }
 0x309   : > { %p1180_p4 = scmp.ge.s32.totalorder %s886_s24, 2  ;;  %s625_s18 = scalar_lea.sflag [#allocation4], %s624_s16 }
 0x30b   : > { %p736_p5 = pnand %p1180_p4, %p1179_p13 }
 0x30d   : > { %p737_p7 = pneg %p736_p5 }
 0x30f   : > { %869 = dma.done.wait (%p737_p7), %s625_s18, 1024  }
 0x310   : > { %871 = vsyncadd (%p737_p7), %s625_s18, 4294966272  ;;  %p19_p8 = scmp.ge.s32.totalorder %s957_s27, 4   ;;  %s1181_s21 = smov %s878_s22 }
 0x311   : > { %s1182_s22 = smov %s882_s23  ;;  %s1183_s23 = smov %s969_s30 }
 0x312   : > { %s1184_s24 = smov %s957_s27  ;;  %21 = sbr.rel (!%p19_p8) target bundleno = 5 (0x5), region = 89 }
 0x317   :  { %630 = vsyncpa [#allocation3], 1 }
 0x318   :  { %632 = vsyncpa [#allocation3 + $0x1], 1 }
 0x319   :  { %633 = vsyncpa [#allocation4], 1 }
 0x31a   :  { %635 = vsyncpa [#allocation4 + $0x1], 1 }

</bundles_post_ra>
